<compile_context>
chip_gen: v5e
topology: v5e:2x2
jax: 0.10.0
libtpu: 0.0.40
codegen_flags: <defaults>
</compile_context>

<pallas_src>
import functools

import jax
import jax.numpy as jnp
from jax.experimental import pallas as pl
from jax.experimental.pallas import tpu as pltpu


def _round_up(x, m):
    return (x + m - 1) // m * m


def _layernorm(x, gamma, beta, eps=1e-5):
    # PyTorch nn.LayerNorm: biased variance over the last dim, eps inside rsqrt.
    # One-pass statistics (sum and sum-of-squares) -> half the XLU reduce traffic.
    n = x.shape[-1]
    mean = jnp.sum(x, axis=-1, keepdims=True) * (1.0 / n)
    meansq = jnp.sum(x * x, axis=-1, keepdims=True) * (1.0 / n)
    var = meansq - mean * mean
    return (x - mean) * jax.lax.rsqrt(var + eps) * gamma + beta


def _fused_kernel(ids_ref, feat_ref, wblob_ref, vblob_ref, out_ref, *,
                  nu, n_emb_pad, hdim, fdim, offs):
    d2, d1, dh = 2 * hdim, hdim, hdim // 2
    tile_b = ids_ref.shape[0]
    f32, bf16 = jnp.float32, jnp.bfloat16

    ids = ids_ref[...]                        # (TILE_B, 2) int32
    uid = ids[:, 0:1]
    pid = ids[:, 1:2]

    vb = vblob_ref[...]                       # (16, 2h) f32: biases/gammas/betas

    # ---- fc1: w1's user/process halves were pre-folded into the embedding
    # tables at pack time, so the gather IS the fc1 user/process contraction.
    # Both gathers are merged into one one-hot matmul against the stacked
    # [U'; P'] table: row uid -> u_emb @ W1u, row nu+pid -> p_emb @ W1p.
    # TODO(synk): for large user/process tables keep them in HBM
    # (memory_space=pl.ANY) and row-gather with a double-buffered
    # make_async_copy driven by scalar-prefetched ids instead of the one-hot.
    col = jax.lax.broadcasted_iota(jnp.int32, (tile_b, n_emb_pad), 1)
    onehot = ((col == uid).astype(f32) + (col == (pid + nu)).astype(f32)
              ).astype(bf16)                                        # (B, NU+NP)
    emb_tab = wblob_ref[pl.ds(offs["emb"], n_emb_pad), :]           # bf16
    x = jnp.dot(onehot, emb_tab, preferred_element_type=f32)        # (B, 2h)
    x = x + vb[0:1, :]                                              # + b1

    feat = feat_ref[...]                                            # (B, f) f32
    w1f = wblob_ref[pl.ds(offs["w1f"], fdim), :]                    # (f, 2h)
    if fdim == 1:
        x = x + feat * w1f.astype(f32)        # VPU broadcast, no 1-row dot
    else:
        x = x + jnp.dot(feat.astype(bf16), w1f, preferred_element_type=f32)
    x = jnp.maximum(_layernorm(x, vb[1:2, :], vb[2:3, :]), 0.0)
    # dropout1: identity in eval

    # ---- fc2 + ln2 + relu (ref-side slice of both dims; padded lanes skipped)
    w2 = wblob_ref[pl.ds(offs["w2"], d2), pl.ds(0, d1)]             # (2h, h)
    x = jnp.dot(x.astype(bf16), w2, preferred_element_type=f32) + vb[3:4, :d1]
    x = jnp.maximum(_layernorm(x, vb[4:5, :d1], vb[5:6, :d1]), 0.0)
    # dropout2: identity in eval

    # ---- fc3 + ln3 + relu --------------------------------------------------
    w3 = wblob_ref[pl.ds(offs["w3"], d1), pl.ds(0, dh)]             # (h, h/2)
    x = jnp.dot(x.astype(bf16), w3, preferred_element_type=f32) + vb[6:7, :dh]
    x = jnp.maximum(_layernorm(x, vb[7:8, :dh], vb[8:9, :dh]), 0.0)

    # ---- fc4 + exp: width-1 output on VPU + XLU reduce (no 1-col MXU dot) --
    w4 = wblob_ref[pl.ds(offs["w4"], 1), pl.ds(0, dh)].astype(f32)  # (1, h/2)
    logit = jnp.sum(x * w4, axis=-1, keepdims=True) + vb[9:10, 0:1]
    intens = jnp.exp(logit)                                         # (B, 1) f32

    # ---- lane-dense store: turn the (B,1) column into a (1,B) row so the
    # writeback is a single unmasked lane-major store (avoids B masked
    # vst.msk partial stores + a width-1 DMA).  Identity-mask cross-sublane
    # reduce; XLU/VPU are idle at this point.
    row = jax.lax.broadcasted_iota(jnp.int32, (tile_b, tile_b), 0)
    lane = jax.lax.broadcasted_iota(jnp.int32, (tile_b, tile_b), 1)
    eye = (row == lane).astype(f32)
    out_ref[...] = jnp.sum(eye * intens, axis=0, keepdims=True)     # (1, B)


def pack_params(params, num_users, num_processes, hidden_dim, feature_dim):
    """Pack all parameters into two VMEM-friendly blobs (done once, offline)."""
    h = hidden_dim
    d2 = 2 * h
    f32 = jnp.float32

    w1 = jnp.asarray(params["w1"], f32)                        # (4h+f, 2h)
    u_tab = jnp.asarray(params["user_embedding"], f32)         # (NU, 2h)
    p_tab = jnp.asarray(params["process_embedding"], f32)      # (NP, 2h)
    # Fold fc1's user/process sub-matrices into the tables: the in-kernel
    # gather then directly produces u_emb @ W1u + p_emb @ W1p.
    emb_folded = jnp.concatenate(
        [u_tab @ w1[:d2, :], p_tab @ w1[d2:2 * d2, :]], axis=0)   # (NU+NP, 2h)

    def pad_cols(a, width=d2):
        a = jnp.asarray(a, f32)
        if a.ndim == 1:
            a = a.reshape(1, -1)
        return jnp.pad(a, ((0, 0), (0, width - a.shape[1])))

    segs = [
        ("emb", emb_folded),                          # (NU+NP, 2h)
        ("w1f", w1[2 * d2:, :]),                      # (f, 2h) feature part
        ("w2", pad_cols(params["w2"])),               # (2h, 2h) zero-pad lanes
        ("w3", pad_cols(params["w3"])),               # (h,  2h) zero-pad lanes
        ("w4", pad_cols(jnp.asarray(params["w4"], f32).T)),      # (1, 2h)
    ]
    offsets, rows, off = {}, [], 0
    for name, a in segs:
        a = jnp.asarray(a, f32)
        r16 = _round_up(a.shape[0], 16)               # bf16 sublane packing = 16
        offsets[name] = off
        rows.append(jnp.pad(a, ((0, r16 - a.shape[0]), (0, 0))))
        off += r16
    # Weight blob stored in bf16: native MXU datapath, half the VMEM footprint.
    wblob = jnp.concatenate(rows, axis=0).astype(jnp.bfloat16)    # (R, 2h)

    vrows = [pad_cols(params[k]) for k in
             ("b1", "g1", "be1", "b2", "g2", "be2", "b3", "g3", "be3", "b4")]
    vrows.append(jnp.zeros((16 - len(vrows), d2), f32))
    vblob = jnp.concatenate(vrows, axis=0)                        # (16, 2h) f32

    meta = dict(offsets=offsets, hidden_dim=hidden_dim, feature_dim=feature_dim,
                num_users=num_users, num_processes=num_processes,
                n_emb_pad=_round_up(num_users + num_processes, 16))
    return {"wblob": wblob, "vblob": vblob, "meta": meta}


def edr_online_dmhp_forward(user_ids, proc_ids, features, packed, *, tile_b=512):
    """Fused forward: embedding gather + 4xLinear + 3xLayerNorm + ReLU + exp."""
    meta = packed["meta"]
    hdim, fdim = meta["hidden_dim"], meta["feature_dim"]
    nu, n_emb_pad = meta["num_users"], meta["n_emb_pad"]

    b = user_ids.shape[0]
    tile_b = min(tile_b, _round_up(b, 8))
    if _round_up(b, tile_b) != tile_b:          # more than one tile ->
        tile_b = _round_up(tile_b, 128)         #   output blocks must be 128-aligned
    b_pad = _round_up(b, tile_b)
    n_tiles = b_pad // tile_b

    ids = jnp.stack([user_ids.astype(jnp.int32),
                     proc_ids.astype(jnp.int32)], axis=1)         # (B, 2)
    feats = features.astype(jnp.float32)
    if b_pad != b:                              # tail padding: valid id-0 /
        ids = jnp.pad(ids, ((0, b_pad - b), (0, 0)))              # zero-feature
        feats = jnp.pad(feats, ((0, b_pad - b), (0, 0)))          # rows

    wblob, vblob = packed["wblob"], packed["vblob"]

    # Scoped-VMEM budget: resident param blobs (double-buffered by the default
    # pipeline), double-buffered per-tile I/O plus an activation allowance,
    # clamped to v7x's 64 MiB physical VMEM.
    # TODO(synk): single-buffer the constant-index param blobs
    # (pipeline_mode=pl.Buffered(1)) once large embedding tables make their
    # double-buffered resident copy the VMEM bottleneck.
    def nbytes(a):
        return a.size * a.dtype.itemsize
    act_bytes = tile_b * (n_emb_pad + tile_b + 8 * 2 * hdim) * 4
    est = (2 * (nbytes(wblob) + nbytes(vblob))
           + 2 * (tile_b * 2 * 4 + tile_b * fdim * 4 + tile_b * 4)
           + act_bytes)
    vmem_limit = int(min(max(2 * est, 32 * 1024 * 1024), 64 * 1024 * 1024))

    kernel = functools.partial(_fused_kernel, nu=nu, n_emb_pad=n_emb_pad,
                               hdim=hdim, fdim=fdim, offs=meta["offsets"])

    out = pl.pallas_call(
        kernel,
        out_shape=jax.ShapeDtypeStruct((1, b_pad), jnp.float32),   # lane-dense
        grid=(n_tiles,),
        in_specs=[
            pl.BlockSpec((tile_b, 2), lambda i: (i, 0)),        # packed ids
            pl.BlockSpec((tile_b, fdim), lambda i: (i, 0)),     # features
            pl.BlockSpec(wblob.shape, lambda i: (0, 0)),        # weights, resident
            pl.BlockSpec(vblob.shape, lambda i: (0, 0)),        # vectors, resident
        ],
        out_specs=pl.BlockSpec((1, tile_b), lambda i: (0, i)),
        compiler_params=pltpu.CompilerParams(
            # TODO(synk): verify both v7x TensorCores are active via xprof;
            # if one is idle, switch this axis to pltpu.CORE_PARALLEL.
            dimension_semantics=("parallel",),
            vmem_limit_bytes=vmem_limit),
    )(ids, feats, wblob, vblob)

    out = out.reshape(b_pad, 1)
    return out if b_pad == b else out[:b]


def init_params(key, num_users, num_processes, hidden_dim, feature_dim):
    """Deterministic synthetic parameter init (PyTorch-style uniform ranges)."""
    def linear(key, fan_in, fan_out):
        k1, k2 = jax.random.split(key)
        bound = 1.0 / jnp.sqrt(float(fan_in))
        w = jax.random.uniform(k1, (fan_in, fan_out), jnp.float32, -bound, bound)
        b = jax.random.uniform(k2, (1, fan_out), jnp.float32, -bound, bound)
        return w, b

    keys = jax.random.split(key, 8)
    h = hidden_dim
    d_in = 4 * h + feature_dim

    params = {}
    params["user_embedding"] = jax.random.normal(keys[0], (num_users, 2 * h), jnp.float32)
    params["process_embedding"] = jax.random.normal(keys[1], (num_processes, 2 * h), jnp.float32)

    params["w1"], params["b1"] = linear(keys[2], d_in, 2 * h)
    params["g1"] = jnp.ones((1, 2 * h), jnp.float32)
    params["be1"] = jnp.zeros((1, 2 * h), jnp.float32)

    params["w2"], params["b2"] = linear(keys[3], 2 * h, h)
    params["g2"] = jnp.ones((1, h), jnp.float32)
    params["be2"] = jnp.zeros((1, h), jnp.float32)

    params["w3"], params["b3"] = linear(keys[4], h, h // 2)
    params["g3"] = jnp.ones((1, h // 2), jnp.float32)
    params["be3"] = jnp.zeros((1, h // 2), jnp.float32)

    params["w4"], params["b4"] = linear(keys[5], h // 2, 1)
    return params


if __name__ == "__main__":
    # Small, module-consistent shapes (hidden_dim overridden from default 256).
    num_users, num_processes = 16, 8
    hidden_dim, feature_dim = 32, 1
    batch = 8

    key = jax.random.PRNGKey(0)
    k_params, k_uid, k_pid, k_feat = jax.random.split(key, 4)

    params = init_params(k_params, num_users, num_processes, hidden_dim, feature_dim)
    packed = pack_params(params, num_users, num_processes, hidden_dim, feature_dim)

    user_ids = jax.random.randint(k_uid, (batch,), 0, num_users)
    proc_ids = jax.random.randint(k_pid, (batch,), 0, num_processes)
    features = jax.random.normal(k_feat, (batch, feature_dim), jnp.float32)

    intensity = edr_online_dmhp_forward(user_ids, proc_ids, features, packed)
    jax.block_until_ready(intensity)

    # Reference check in plain JAX (torch-module math, f32) to verify the kernel.
    # Tolerance relaxed vs. the previous version because MXU operands / the
    # weight blob are now bf16 (accumulation, LayerNorm and exp remain f32).
    def ref_forward(uid, pid, feat, p):
        ue = jnp.take(p["user_embedding"], uid, axis=0)
        pe = jnp.take(p["process_embedding"], pid, axis=0)
        x = jnp.concatenate([ue, pe, feat], axis=1)
        h = x @ p["w1"] + p["b1"]
        h = jnp.maximum(_layernorm(h, p["g1"], p["be1"]), 0.0)
        h = h @ p["w2"] + p["b2"]
        h = jnp.maximum(_layernorm(h, p["g2"], p["be2"]), 0.0)
        h = h @ p["w3"] + p["b3"]
        h = jnp.maximum(_layernorm(h, p["g3"], p["be3"]), 0.0)
        return jnp.exp(h @ p["w4"] + p["b4"])

    ref = ref_forward(user_ids, proc_ids, features, params)
    assert intensity.shape == (batch, 1)
    assert bool(jnp.all(jnp.isfinite(intensity)))
    assert jnp.allclose(intensity, ref, rtol=0.1, atol=0.02)

    print("KERNEL_OK")
</pallas_src>

<mosaic_0001>
module attributes {stable_mosaic.version = 11 : i64} {
  func.func @_fused_kernel(%arg0: i32, %arg1: memref<8x2xi32, #tpu.memory_space<vmem>>, %arg2: memref<8x1xf32, #tpu.memory_space<vmem>>, %arg3: memref<160x64xbf16, #tpu.memory_space<vmem>>, %arg4: memref<16x64xf32, #tpu.memory_space<vmem>>, %arg5: memref<1x8xf32, #tpu.memory_space<vmem>>) attributes {dimension_semantics = [#tpu.dimension_semantics<parallel>], iteration_bounds = array<i64: 1>, scalar_prefetch = 0 : i64, scratch_operands = 0 : i64, tpu.core_type = #tpu.core_type<tc>, window_params = [{transform_indices = @transform_0, window_bounds = array<i64: 8, 2>}, {transform_indices = @transform_1, window_bounds = array<i64: 8, 1>}, {pipeline_mode = #tpu.pipeline_mode<synchronous>, transform_indices = @transform_2, window_bounds = array<i64: 160, 64>}, {pipeline_mode = #tpu.pipeline_mode<synchronous>, transform_indices = @transform_3, window_bounds = array<i64: 16, 64>}, {transform_indices = @transform_4, window_bounds = array<i64: 1, 8>}]} {
    %c0 = arith.constant 0 : index
    %c0_0 = arith.constant 0 : index
    %0 = vector.load %arg1[%c0, %c0_0] : memref<8x2xi32, #tpu.memory_space<vmem>>, vector<8x2xi32>
    %1 = vector.extract_strided_slice %0 {offsets = [0, 0], sizes = [8, 1], strides = [1, 1]} : vector<8x2xi32> to vector<8x1xi32>
    %2 = vector.extract_strided_slice %0 {offsets = [0, 1], sizes = [8, 1], strides = [1, 1]} : vector<8x2xi32> to vector<8x1xi32>
    %c0_1 = arith.constant 0 : index
    %c0_2 = arith.constant 0 : index
    %3 = vector.load %arg4[%c0_1, %c0_2] : memref<16x64xf32, #tpu.memory_space<vmem>>, vector<16x64xf32>
    %4 = tpu.iota {dimensions = array<i32: 1>} : vector<8x32xi32>
    %5 = vector.broadcast %1 : vector<8x1xi32> to vector<8x32xi32>
    %6 = arith.cmpi eq, %4, %5 : vector<8x32xi32>
    %7 = arith.extui %6 : vector<8x32xi1> to vector<8x32xi32>
    %8 = arith.sitofp %7 : vector<8x32xi32> to vector<8x32xf32>
    %c16_i32 = arith.constant 16 : i32
    %9 = vector.broadcast %c16_i32 : i32 to vector<8x1xi32>
    %10 = arith.addi %2, %9 : vector<8x1xi32>
    %11 = vector.broadcast %10 : vector<8x1xi32> to vector<8x32xi32>
    %12 = arith.cmpi eq, %4, %11 : vector<8x32xi32>
    %13 = arith.extui %12 : vector<8x32xi1> to vector<8x32xi32>
    %14 = arith.sitofp %13 : vector<8x32xi32> to vector<8x32xf32>
    %15 = arith.addf %8, %14 : vector<8x32xf32>
    %16 = arith.truncf %15 : vector<8x32xf32> to vector<8x32xbf16>
    %c0_3 = arith.constant 0 : index
    %c0_4 = arith.constant 0 : index
    %17 = vector.load %arg3[%c0_3, %c0_4] : memref<160x64xbf16, #tpu.memory_space<vmem>>, vector<32x64xbf16>
    %cst = arith.constant dense<0.000000e+00> : vector<8x64xf32>
    %18 = tpu.matmul %16, %17, %cst {dimension_numbers = #tpu.dot_dimension_numbers<[1], [0], [0], [1], [0, 0, 1, 1], [], []>} : vector<8x32xbf16>, vector<32x64xbf16>, vector<8x64xf32> -> vector<8x64xf32>
    %19 = vector.extract_strided_slice %3 {offsets = [0, 0], sizes = [1, 64], strides = [1, 1]} : vector<16x64xf32> to vector<1x64xf32>
    %20 = vector.broadcast %19 : vector<1x64xf32> to vector<8x64xf32>
    %21 = arith.addf %18, %20 : vector<8x64xf32>
    %c0_5 = arith.constant 0 : index
    %c0_6 = arith.constant 0 : index
    %22 = vector.load %arg2[%c0_5, %c0_6] : memref<8x1xf32, #tpu.memory_space<vmem>>, vector<8x1xf32>
    %c32 = arith.constant 32 : index
    %c0_7 = arith.constant 0 : index
    %23 = vector.load %arg3[%c32, %c0_7] : memref<160x64xbf16, #tpu.memory_space<vmem>>, vector<1x64xbf16>
    %24 = arith.extf %23 : vector<1x64xbf16> to vector<1x64xf32>
    %25 = vector.broadcast %22 : vector<8x1xf32> to vector<8x64xf32>
    %26 = vector.broadcast %24 : vector<1x64xf32> to vector<8x64xf32>
    %27 = arith.mulf %25, %26 : vector<8x64xf32>
    %28 = arith.addf %21, %27 : vector<8x64xf32>
    %29 = vector.extract_strided_slice %3 {offsets = [1, 0], sizes = [1, 64], strides = [1, 1]} : vector<16x64xf32> to vector<1x64xf32>
    %30 = vector.extract_strided_slice %3 {offsets = [2, 0], sizes = [1, 64], strides = [1, 1]} : vector<16x64xf32> to vector<1x64xf32>
    %cst_8 = arith.constant dense<0.000000e+00> : vector<8xf32>
    %31 = vector.multi_reduction <add>, %28, %cst_8 [1] : vector<8x64xf32> to vector<8xf32>
    %32 = vector.shape_cast %31 : vector<8xf32> to vector<8x1xf32>
    %cst_9 = arith.constant 1.562500e-02 : f32
    %33 = vector.broadcast %cst_9 : f32 to vector<8x1xf32>
    %34 = arith.mulf %32, %33 : vector<8x1xf32>
    %35 = arith.mulf %28, %28 : vector<8x64xf32>
    %cst_10 = arith.constant dense<0.000000e+00> : vector<8xf32>
    %36 = vector.multi_reduction <add>, %35, %cst_10 [1] : vector<8x64xf32> to vector<8xf32>
    %37 = vector.shape_cast %36 : vector<8xf32> to vector<8x1xf32>
    %cst_11 = arith.constant 1.562500e-02 : f32
    %38 = vector.broadcast %cst_11 : f32 to vector<8x1xf32>
    %39 = arith.mulf %37, %38 : vector<8x1xf32>
    %40 = arith.mulf %34, %34 : vector<8x1xf32>
    %41 = arith.subf %39, %40 : vector<8x1xf32>
    %42 = vector.broadcast %34 : vector<8x1xf32> to vector<8x64xf32>
    %43 = arith.subf %28, %42 : vector<8x64xf32>
    %cst_12 = arith.constant 9.99999974E-6 : f32
    %44 = vector.broadcast %cst_12 : f32 to vector<8x1xf32>
    %45 = arith.addf %41, %44 : vector<8x1xf32>
    %46 = math.rsqrt %45 : vector<8x1xf32>
    %47 = vector.broadcast %46 : vector<8x1xf32> to vector<8x64xf32>
    %48 = arith.mulf %43, %47 : vector<8x64xf32>
    %49 = vector.broadcast %29 : vector<1x64xf32> to vector<8x64xf32>
    %50 = arith.mulf %48, %49 : vector<8x64xf32>
    %51 = vector.broadcast %30 : vector<1x64xf32> to vector<8x64xf32>
    %52 = arith.addf %50, %51 : vector<8x64xf32>
    %cst_13 = arith.constant 0.000000e+00 : f32
    %53 = vector.broadcast %cst_13 : f32 to vector<8x64xf32>
    %54 = arith.maximumf %52, %53 : vector<8x64xf32>
    %c48 = arith.constant 48 : index
    %c0_14 = arith.constant 0 : index
    %55 = vector.load %arg3[%c48, %c0_14] : memref<160x64xbf16, #tpu.memory_space<vmem>>, vector<64x32xbf16>
    %56 = arith.truncf %54 : vector<8x64xf32> to vector<8x64xbf16>
    %cst_15 = arith.constant dense<0.000000e+00> : vector<8x32xf32>
    %57 = tpu.matmul %56, %55, %cst_15 {dimension_numbers = #tpu.dot_dimension_numbers<[1], [0], [0], [1], [0, 0, 1, 1], [], []>} : vector<8x64xbf16>, vector<64x32xbf16>, vector<8x32xf32> -> vector<8x32xf32>
    %58 = vector.extract_strided_slice %3 {offsets = [3, 0], sizes = [1, 32], strides = [1, 1]} : vector<16x64xf32> to vector<1x32xf32>
    %59 = vector.broadcast %58 : vector<1x32xf32> to vector<8x32xf32>
    %60 = arith.addf %57, %59 : vector<8x32xf32>
    %61 = vector.extract_strided_slice %3 {offsets = [4, 0], sizes = [1, 32], strides = [1, 1]} : vector<16x64xf32> to vector<1x32xf32>
    %62 = vector.extract_strided_slice %3 {offsets = [5, 0], sizes = [1, 32], strides = [1, 1]} : vector<16x64xf32> to vector<1x32xf32>
    %cst_16 = arith.constant dense<0.000000e+00> : vector<8xf32>
    %63 = vector.multi_reduction <add>, %60, %cst_16 [1] : vector<8x32xf32> to vector<8xf32>
    %64 = vector.shape_cast %63 : vector<8xf32> to vector<8x1xf32>
    %cst_17 = arith.constant 3.125000e-02 : f32
    %65 = vector.broadcast %cst_17 : f32 to vector<8x1xf32>
    %66 = arith.mulf %64, %65 : vector<8x1xf32>
    %67 = arith.mulf %60, %60 : vector<8x32xf32>
    %cst_18 = arith.constant dense<0.000000e+00> : vector<8xf32>
    %68 = vector.multi_reduction <add>, %67, %cst_18 [1] : vector<8x32xf32> to vector<8xf32>
    %69 = vector.shape_cast %68 : vector<8xf32> to vector<8x1xf32>
    %cst_19 = arith.constant 3.125000e-02 : f32
    %70 = vector.broadcast %cst_19 : f32 to vector<8x1xf32>
    %71 = arith.mulf %69, %70 : vector<8x1xf32>
    %72 = arith.mulf %66, %66 : vector<8x1xf32>
    %73 = arith.subf %71, %72 : vector<8x1xf32>
    %74 = vector.broadcast %66 : vector<8x1xf32> to vector<8x32xf32>
    %75 = arith.subf %60, %74 : vector<8x32xf32>
    %cst_20 = arith.constant 9.99999974E-6 : f32
    %76 = vector.broadcast %cst_20 : f32 to vector<8x1xf32>
    %77 = arith.addf %73, %76 : vector<8x1xf32>
    %78 = math.rsqrt %77 : vector<8x1xf32>
    %79 = vector.broadcast %78 : vector<8x1xf32> to vector<8x32xf32>
    %80 = arith.mulf %75, %79 : vector<8x32xf32>
    %81 = vector.broadcast %61 : vector<1x32xf32> to vector<8x32xf32>
    %82 = arith.mulf %80, %81 : vector<8x32xf32>
    %83 = vector.broadcast %62 : vector<1x32xf32> to vector<8x32xf32>
    %84 = arith.addf %82, %83 : vector<8x32xf32>
    %cst_21 = arith.constant 0.000000e+00 : f32
    %85 = vector.broadcast %cst_21 : f32 to vector<8x32xf32>
    %86 = arith.maximumf %84, %85 : vector<8x32xf32>
    %c112 = arith.constant 112 : index
    %c0_22 = arith.constant 0 : index
    %87 = vector.load %arg3[%c112, %c0_22] : memref<160x64xbf16, #tpu.memory_space<vmem>>, vector<32x16xbf16>
    %88 = arith.truncf %86 : vector<8x32xf32> to vector<8x32xbf16>
    %cst_23 = arith.constant dense<0.000000e+00> : vector<8x16xf32>
    %89 = tpu.matmul %88, %87, %cst_23 {dimension_numbers = #tpu.dot_dimension_numbers<[1], [0], [0], [1], [0, 0, 1, 1], [], []>} : vector<8x32xbf16>, vector<32x16xbf16>, vector<8x16xf32> -> vector<8x16xf32>
    %90 = vector.extract_strided_slice %3 {offsets = [6, 0], sizes = [1, 16], strides = [1, 1]} : vector<16x64xf32> to vector<1x16xf32>
    %91 = vector.broadcast %90 : vector<1x16xf32> to vector<8x16xf32>
    %92 = arith.addf %89, %91 : vector<8x16xf32>
    %93 = vector.extract_strided_slice %3 {offsets = [7, 0], sizes = [1, 16], strides = [1, 1]} : vector<16x64xf32> to vector<1x16xf32>
    %94 = vector.extract_strided_slice %3 {offsets = [8, 0], sizes = [1, 16], strides = [1, 1]} : vector<16x64xf32> to vector<1x16xf32>
    %cst_24 = arith.constant dense<0.000000e+00> : vector<8xf32>
    %95 = vector.multi_reduction <add>, %92, %cst_24 [1] : vector<8x16xf32> to vector<8xf32>
    %96 = vector.shape_cast %95 : vector<8xf32> to vector<8x1xf32>
    %cst_25 = arith.constant 6.250000e-02 : f32
    %97 = vector.broadcast %cst_25 : f32 to vector<8x1xf32>
    %98 = arith.mulf %96, %97 : vector<8x1xf32>
    %99 = arith.mulf %92, %92 : vector<8x16xf32>
    %cst_26 = arith.constant dense<0.000000e+00> : vector<8xf32>
    %100 = vector.multi_reduction <add>, %99, %cst_26 [1] : vector<8x16xf32> to vector<8xf32>
    %101 = vector.shape_cast %100 : vector<8xf32> to vector<8x1xf32>
    %cst_27 = arith.constant 6.250000e-02 : f32
    %102 = vector.broadcast %cst_27 : f32 to vector<8x1xf32>
    %103 = arith.mulf %101, %102 : vector<8x1xf32>
    %104 = arith.mulf %98, %98 : vector<8x1xf32>
    %105 = arith.subf %103, %104 : vector<8x1xf32>
    %106 = vector.broadcast %98 : vector<8x1xf32> to vector<8x16xf32>
    %107 = arith.subf %92, %106 : vector<8x16xf32>
    %cst_28 = arith.constant 9.99999974E-6 : f32
    %108 = vector.broadcast %cst_28 : f32 to vector<8x1xf32>
    %109 = arith.addf %105, %108 : vector<8x1xf32>
    %110 = math.rsqrt %109 : vector<8x1xf32>
    %111 = vector.broadcast %110 : vector<8x1xf32> to vector<8x16xf32>
    %112 = arith.mulf %107, %111 : vector<8x16xf32>
    %113 = vector.broadcast %93 : vector<1x16xf32> to vector<8x16xf32>
    %114 = arith.mulf %112, %113 : vector<8x16xf32>
    %115 = vector.broadcast %94 : vector<1x16xf32> to vector<8x16xf32>
    %116 = arith.addf %114, %115 : vector<8x16xf32>
    %cst_29 = arith.constant 0.000000e+00 : f32
    %117 = vector.broadcast %cst_29 : f32 to vector<8x16xf32>
    %118 = arith.maximumf %116, %117 : vector<8x16xf32>
    %c144 = arith.constant 144 : index
    %c0_30 = arith.constant 0 : index
    %119 = vector.load %arg3[%c144, %c0_30] : memref<160x64xbf16, #tpu.memory_space<vmem>>, vector<1x16xbf16>
    %120 = arith.extf %119 : vector<1x16xbf16> to vector<1x16xf32>
    %121 = vector.broadcast %120 : vector<1x16xf32> to vector<8x16xf32>
    %122 = arith.mulf %118, %121 : vector<8x16xf32>
    %cst_31 = arith.constant dense<0.000000e+00> : vector<8xf32>
    %123 = vector.multi_reduction <add>, %122, %cst_31 [1] : vector<8x16xf32> to vector<8xf32>
    %124 = vector.shape_cast %123 : vector<8xf32> to vector<8x1xf32>
    %125 = vector.extract_strided_slice %3 {offsets = [9, 0], sizes = [1, 1], strides = [1, 1]} : vector<16x64xf32> to vector<1x1xf32>
    %126 = vector.broadcast %125 : vector<1x1xf32> to vector<8x1xf32>
    %127 = arith.addf %124, %126 : vector<8x1xf32>
    %128 = math.exp %127 : vector<8x1xf32>
    %129 = tpu.iota {dimensions = array<i32: 0>} : vector<8x8xi32>
    %130 = tpu.iota {dimensions = array<i32: 1>} : vector<8x8xi32>
    %131 = arith.cmpi eq, %129, %130 : vector<8x8xi32>
    %132 = arith.extui %131 : vector<8x8xi1> to vector<8x8xi32>
    %133 = arith.sitofp %132 : vector<8x8xi32> to vector<8x8xf32>
    %134 = vector.broadcast %128 : vector<8x1xf32> to vector<8x8xf32>
    %135 = arith.mulf %133, %134 : vector<8x8xf32>
    %cst_32 = arith.constant dense<0.000000e+00> : vector<8xf32>
    %136 = vector.multi_reduction <add>, %135, %cst_32 [0] : vector<8x8xf32> to vector<8xf32>
    %137 = vector.shape_cast %136 : vector<8xf32> to vector<1x8xf32>
    %c0_33 = arith.constant 0 : index
    %c0_34 = arith.constant 0 : index
    %138 = vector.load %arg5[%c0_33, %c0_34] : memref<1x8xf32, #tpu.memory_space<vmem>>, vector<1x8xf32>
    tpu.vector_store %arg5[%c0_33, %c0_34], %137 {strides = array<i32>} : memref<1x8xf32, #tpu.memory_space<vmem>>, vector<1x8xf32>,
    return
  }
  func.func @transform_0(%arg0: i32) -> (i32, i32) {
    %c0_i32 = arith.constant 0 : i32
    %c0_i32_0 = arith.constant 0 : i32
    return %arg0, %c0_i32 : i32, i32
  }
  func.func @transform_1(%arg0: i32) -> (i32, i32) {
    %c0_i32 = arith.constant 0 : i32
    %c0_i32_0 = arith.constant 0 : i32
    return %arg0, %c0_i32 : i32, i32
  }
  func.func @transform_2(%arg0: i32) -> (i32, i32) {
    %c0_i32 = arith.constant 0 : i32
    %c0_i32_0 = arith.constant 0 : i32
    %c0_i32_1 = arith.constant 0 : i32
    return %c0_i32, %c0_i32_0 : i32, i32
  }
  func.func @transform_3(%arg0: i32) -> (i32, i32) {
    %c0_i32 = arith.constant 0 : i32
    %c0_i32_0 = arith.constant 0 : i32
    %c0_i32_1 = arith.constant 0 : i32
    return %c0_i32, %c0_i32_0 : i32, i32
  }
  func.func @transform_4(%arg0: i32) -> (i32, i32) {
    %c0_i32 = arith.constant 0 : i32
    %c0_i32_0 = arith.constant 0 : i32
    return %c0_i32, %arg0 : i32, i32
  }
}

</mosaic_0001>

<bundles_post_ra>
// kernel: tpu_custom_call.1
= control target key start
LH: loop header
LB: loop body
LE: loop exit
PB: predicated region body
PF: predicated region fallthrough
CT: control target
= control target key end

     0   :  { %s498_s0 = inlined_call_operand.vmem [shape: s32[8,2], index: 0, kind: input, shape index: {}]   ;;  %s499_s1 = inlined_call_operand.vmem [shape: f32[8,1], index: 1, kind: input, shape index: {}]   ;;  %s500_s2 = inlined_call_operand.vmem [shape: bf16[160,64], index: 2, kind: input, shape index: {}]   ;;  %s501_s3 = inlined_call_operand.vmem [shape: f32[16,64], index: 3, kind: input, shape index: {}]   ;;  %s502_s4 = inlined_call_operand.hbm [shape: f32[1,8], index: 4, kind: output, shape index: {}]  }
   0x1   :  { %v19_v0 = vld [vmem:[%s498_s0] sm:$0xff] }
   0x2   :  { %9 = vsyncpa [#allocation3], 0  ;;  %v394_v1 = vmov 0   ;;  %v30_v2 = vadd.s32 16, %v19_v0  ;;  %v395_v3 = vmov 1   ;;  %v344_v4 = vld [vmem:[%s500_s2 + $0x8] sm:$0xff]  ;;  %v22_v7 = vlaneseq }
   0x3   :  { %355 = vset.pattern.permute.xlu0 %v394_v1  ;;  %357 = vset.pattern.permute.xlu1 %v394_v1  ;;  %v343_v5 = vld [vmem:[%s500_s2] sm:$0xff]  ;;  %v396_v11 = vmov 0.0   ;;  %vm56_vm2 = vcmask 261120   ;;  %v74_v16 = vld [vmem:[%s500_s2 + $0x10] sm:$0x1]  ;;  %vm84_vm3 = vcmask 523264  }
   0x4   :  { %25 = vperm.xlu0 %355, %v19_v0   ;;  %358 = vset.pattern.permute.xlu2 %v394_v1  ;;  %v73_v6 = vld [vmem:[%s499_s1] sm:$0xff]  ;;  %v436_v9 = vand.u32 127, %v22_v7  ;;  %v75_v17 = vunpack.c.l.bf16 %v74_v16  ;;  %v348_v30 = vld [vmem:[%s500_s2 + $0x30] sm:$0xff]  ;;  %v347_v31 = vld [vmem:[%s500_s2 + $0x28] sm:$0xff]  ;;  %vm227_vm10 = vcmask 130048   ;;  %vm279_vm15 = vcmask 64512  }
   0x5   :  { %66 = vmatpush.bf16.msra.mxu0 %v344_v4  ;;  %78 = vperm.xlu1 %357, %v73_v6   ;;  %v449_v18 = vld [vmem:[%s501_s3] sm:$0xff]  ;;  %v345_v33 = vld [vmem:[%s500_s2 + $0x18] sm:$0xff]  ;;  %s296_s17 = sshll.u32 %s502_s4, 4  ;;  %s297_s17 = int_to_ptr.hbm [resolvable:$true] %s296_s17 }
   0x6   :  { %v81_v19 = vperm.slane %v75_v17, 0  ;;  %v43_v21 = vperm.slane %v449_v18, 0  ;;  %155 = vmatpush.bf16.msra.mxu1 %v348_v30  ;;  %v346_v32 = vld [vmem:[%s500_s2 + $0x20] sm:$0xff]  ;;  %v109_v48 = vperm.slane %v449_v18, 1  ;;  %v111_v51 = vperm.slane %v449_v18, 2 }
   0x7   :  { %v123_v56 = vperm.slane %v449_v18, 3  ;;  %v350_v63 = vld [vmem:[%s500_s2 + $0x40] sm:$0xff] }
   0x8   :  { %220 = vmatpush.bf16.msra.mxu2 %v350_v63 }
   0x9   :  { %67 = vmatpush.bf16.msra.mxu0 %v343_v5 }
   0xa   :  { %156 = vmatpush.bf16.msra.mxu1 %v347_v31 }
   0xc   :  { %356 = vset.pattern.permute.xlu0 %v395_v3 }
   0xd   :  { %32 = vperm.xlu0 %356, %v30_v2  }
   0xe   :  { %157 = vmatpush.bf16.msra.mxu1 %v346_v32 }
  0x12   :  { %158 = vmatpush.bf16.msra.mxu1 %v345_v33 }
  0x15   :  { %359 = vset.pattern.permute.xlu0 %v394_v1  ;;  %v349_v1 = vld [vmem:[%s500_s2 + $0x38] sm:$0xff] }
  0x16   :  { %221 = vmatpush.bf16.msra.mxu2 %v349_v1 }
  0x76   :  { %v26_v8 = vpop.permute.xlu0 %25 }
  0x77   :  { %vm27_vm0 = vcmp.eq.s32.totalorder %v436_v9, %v26_v8  ;;  %v79_v20 = vpop.permute.xlu1 %78 }
  0x78   :  { %v305_v12 = vsel %vm27_vm0, 1.0, %v396_v11  ;;  %v82_v22 = vmul.f32 %v81_v19, %v79_v20  ;;  %v188_v19 = vperm.slane %v449_v18, 4  ;;  %vm287_vm0 = vcmask 57344  }
  0x7f   :  { %v33_v10 = vpop.permute.xlu0 %32 }
  0x80   :  { %vm34_vm1 = vcmp.eq.s32.totalorder %v436_v9, %v33_v10 }
  0x81   :  { %v306_v13 = vsel %vm34_vm1, 1.0, %v396_v11 }
  0x82   :  { %v37_v14 = vadd.f32 %v306_v13, %v305_v12 }
  0x84   :  { %v38_v15 = vpack.c.bf16 %v37_v14, %v37_v14 }
  0x86   :  { %315 = vmatmul.msk.bf16.vlgmr.msra.gmra.mxu0 %vm56_vm2, %v38_v15 }
 0x103   :  { %v69_v23 = vpop.f32.mrf.mxu0 }
 0x104   :  { %v70_v24 = vadd.f32 %v69_v23, %v43_v21 }
 0x106   :  { %v83_v25 = vadd.f32 %v82_v22, %v70_v24  ;;  %v190_v22 = vperm.slane %v449_v18, 5 }
 0x108   :  { %v85_v26 = vsel %vm84_vm3, %v83_v25, 0.0  ;;  %v89_v27 = vmul.f32 %v83_v25, %v83_v25 }
 0x109   :  { %86 = vadd.xlane.f32.xlu1 %v85_v26 }
 0x10a   :  { %v90_v28 = vsel %vm84_vm3, %v89_v27, 0.0  ;;  %v198_v27 = vperm.slane %v449_v18, 6 }
 0x10b   :  { %v71_v29 = vpop.f32.mrf.mxu0  ;;  %91 = vadd.xlane.f32.xlu2 %v90_v28 }
 0x17c   :  { %v87_v34 = vpop.xlane.xlu1 %86 }
 0x17d   :  { %v88_v35 = vmul.f32 0.015625, %v87_v34 }
 0x17e   :  { %v92_v36 = vpop.xlane.xlu2 %91 }
 0x17f   :  { %v94_v37 = vmul.f32 %v88_v35, %v88_v35  ;;  %v93_v38 = vmul.f32 0.015625, %v92_v36  ;;  %v96_v47 = vsub.f32 %v83_v25, %v88_v35 }
 0x181   :  { %v95_v39 = vsub.f32 %v93_v38, %v94_v37 }
 0x183   :  { %v97_v40 = vadd.f32 1e-05, %v95_v39 }
 0x185   :  { %360 = vrsqrt.f32 %v97_v40  ;;  %vm104_vm5 = vweird.f32 %v97_v40 }
 0x18b   :  { %v361_v41 = vpop.eup %360 }
 0x18c   :  { %v99_v42 = vmul.f32 %v361_v41, %v97_v40  ;;  %vm105_vm4 = vweird.f32 %v361_v41 }
 0x18d   :  { %vm106_vm6 = vmor %vm104_vm5, %vm105_vm4 }
 0x18e   :  { %v100_v43 = vmul.f32 %v361_v41, %v99_v42 }
 0x190   :  { %v101_v44 = vmul.f32 0.5, %v100_v43 }
 0x192   :  { %v102_v45 = vsub.f32 1.5, %v101_v44 }
 0x194   :  { %v103_v46 = vmul.f32 %v361_v41, %v102_v45 }
 0x196   :  { %v107_v49 = vsel %vm106_vm6, %v361_v41, %v103_v46 }
 0x197   :  { %v108_v50 = vmul.f32 %v107_v49, %v96_v47  ;;  %v21_v47 = vld [vmem:[%s501_s3 + $0x8] sm:$0xff] }
 0x199   :  { %v110_v52 = vmul.f32 %v109_v48, %v108_v50  ;;  %v257_v48 = vld [vmem:[%s500_s2 + $0x48] sm:$0x1]  ;;  %v252_v50 = vperm.slane %v449_v18, 7  ;;  %v269_v18 = vshrl.u32 %v22_v7, 7  ;;  %s397_s2 = smov [#allocation2]  }
 0x19a   :  { %s294_s3 = sshll.u32 %s397_s2, 4  ;;  %s295_s3 = int_to_ptr.vmem [resolvable:$true] %s294_s3 }
 0x19b   :  { %v112_v53 = vadd.f32 %v111_v51, %v110_v52  ;;  %vm270_vm14 = vcmp.eq.s32.totalorder %v269_v18, %v436_v9 }
 0x19d   :  { %v113_v54 = vmax.f32 %v112_v53, 0.0  ;;  %v254_v53 = vperm.slane %v21_v47, 0 }
 0x19f   :  { %v122_v55 = vpack.c.bf16 %v113_v54, %v113_v54  ;;  %v258_v54 = vunpack.c.l.bf16 %v257_v48 }
 0x1a1   :  { %332 = vmatmul.msk.bf16.vlgmr.msra.gmra.mxu1 %vm84_vm3, %v122_v55 }
 0x21e   :  { %v160_v57 = vpop.f32.mrf.mxu1 }
 0x21f   :  { %v161_v58 = vadd.f32 %v160_v57, %v123_v56  ;;  %v259_v57 = vperm.slane %v258_v54, 0 }
 0x221   :  { %v164_v59 = vsel %vm56_vm2, %v161_v58, 0.0  ;;  %v168_v60 = vmul.f32 %v161_v58, %v161_v58 }
 0x222   :  { %165 = vadd.xlane.f32.xlu2 %v164_v59 }
 0x223   :  { %v169_v62 = vsel %vm56_vm2, %v168_v60, 0.0 }
 0x226   :  { %v162_v61 = vpop.f32.mrf.mxu1 }
 0x227   :  { %v264_v61 = vperm.slane %v21_v47, 1 }
 0x22a   :  { %170 = vadd.xlane.f32.xlu2 %v169_v62 }
 0x295   :  { %v166_v0 = vpop.xlane.xlu2 %165 }
 0x296   :  { %v167_v2 = vmul.f32 0.03125, %v166_v0 }
 0x298   :  { %v173_v4 = vmul.f32 %v167_v2, %v167_v2  ;;  %v175_v17 = vsub.f32 %v161_v58, %v167_v2  ;;  %v342_v2 = vsel %vm270_vm14, 1.0, %v396_v11 }
 0x29d   :  { %v171_v3 = vpop.xlane.xlu2 %170 }
 0x29e   :  { %v172_v5 = vmul.f32 0.03125, %v171_v3 }
 0x2a0   :  { %v174_v6 = vsub.f32 %v172_v5, %v173_v4 }
 0x2a2   :  { %v176_v8 = vadd.f32 1e-05, %v174_v6 }
 0x2a4   :  { %362 = vrsqrt.f32 %v176_v8  ;;  %vm183_vm8 = vweird.f32 %v176_v8 }
 0x2aa   :  { %v363_v10 = vpop.eup %362 }
 0x2ab   :  { %v178_v12 = vmul.f32 %v363_v10, %v176_v8  ;;  %vm184_vm7 = vweird.f32 %v363_v10 }
 0x2ac   :  { %vm185_vm9 = vmor %vm183_vm8, %vm184_vm7 }
 0x2ad   :  { %v179_v13 = vmul.f32 %v363_v10, %v178_v12 }
 0x2af   :  { %v180_v14 = vmul.f32 0.5, %v179_v13 }
 0x2b1   :  { %v181_v15 = vsub.f32 1.5, %v180_v14 }
 0x2b3   :  { %v182_v16 = vmul.f32 %v363_v10, %v181_v15 }
 0x2b5   :  { %v186_v20 = vsel %vm185_vm9, %v363_v10, %v182_v16 }
 0x2b6   :  { %v187_v21 = vmul.f32 %v186_v20, %v175_v17 }
 0x2b8   :  { %v189_v23 = vmul.f32 %v188_v19, %v187_v21 }
 0x2ba   :  { %v191_v24 = vadd.f32 %v190_v22, %v189_v23 }
 0x2bc   :  { %v192_v25 = vmax.f32 %v191_v24, 0.0 }
 0x2be   :  { %v197_v26 = vpack.c.bf16 %v192_v25, %v192_v25 }
 0x2c0   :  { %341 = vmatmul.msk.bf16.vlgmr.msra.gmra.mxu2 %vm56_vm2, %v197_v26 }
 0x343   :  { %v223_v28 = vpop.f32.mrf.mxu2 }
 0x344   :  { %v224_v29 = vadd.f32 %v223_v28, %v198_v27 }
 0x346   :  { %v228_v30 = vsel %vm227_vm10, %v224_v29, 0.0  ;;  %v232_v31 = vmul.f32 %v224_v29, %v224_v29 }
 0x347   :  { %229 = vadd.xlane.f32.xlu0 %v228_v30 }
 0x348   :  { %v233_v32 = vsel %vm227_vm10, %v232_v31, 0.0 }
 0x349   :  { %234 = vadd.xlane.f32.xlu2 %v233_v32 }
 0x34b   :  { %v225_v33 = vpop.f32.mrf.mxu2 }
 0x3ba   :  { %v230_v34 = vpop.xlane.xlu0 %229 }
 0x3bb   :  { %v231_v35 = vmul.f32 0.0625, %v230_v34 }
 0x3bc   :  { %v235_v36 = vpop.xlane.xlu2 %234 }
 0x3bd   :  { %v237_v37 = vmul.f32 %v231_v35, %v231_v35  ;;  %v236_v38 = vmul.f32 0.0625, %v235_v36  ;;  %v239_v49 = vsub.f32 %v224_v29, %v231_v35 }
 0x3bf   :  { %v238_v39 = vsub.f32 %v236_v38, %v237_v37 }
 0x3c1   :  { %v240_v40 = vadd.f32 1e-05, %v238_v39 }
 0x3c3   :  { %364 = vrsqrt.f32 %v240_v40  ;;  %vm247_vm12 = vweird.f32 %v240_v40 }
 0x3c9   :  { %v365_v41 = vpop.eup %364 }
 0x3ca   :  { %v242_v42 = vmul.f32 %v365_v41, %v240_v40  ;;  %vm248_vm11 = vweird.f32 %v365_v41 }
 0x3cb   :  { %vm249_vm13 = vmor %vm247_vm12, %vm248_vm11 }
 0x3cc   :  { %v243_v43 = vmul.f32 %v365_v41, %v242_v42 }
 0x3ce   :  { %v244_v44 = vmul.f32 0.5, %v243_v43 }
 0x3d0   :  { %v245_v45 = vsub.f32 1.5, %v244_v44 }
 0x3d2   :  { %v246_v46 = vmul.f32 %v365_v41, %v245_v45 }
 0x3d4   :  { %v250_v51 = vsel %vm249_vm13, %v365_v41, %v246_v46 }
 0x3d5   :  { %v251_v52 = vmul.f32 %v250_v51, %v239_v49 }
 0x3d7   :  { %v253_v55 = vmul.f32 %v252_v50, %v251_v52 }
 0x3d9   :  { %v255_v56 = vadd.f32 %v254_v53, %v253_v55 }
 0x3db   :  { %v256_v58 = vmax.f32 %v255_v56, 0.0 }
 0x3dd   :  { %v260_v59 = vmul.f32 %v259_v57, %v256_v58 }
 0x3df   :  { %v261_v60 = vsel %vm227_vm10, %v260_v59, 0.0 }
 0x3e0   :  { %262 = vadd.xlane.f32.xlu2 %v261_v60 }
 0x453   :  { %v263_v62 = vpop.xlane.xlu2 %262 }
 0x454   :  { %v265_v63 = vadd.f32 %v264_v61, %v263_v62 }
 0x456   :  { %v266_v0 = vmul.f32 1.442695, %v265_v63 }
 0x458   :  { %366 = vpow2.f32 %v266_v0 }
 0x45e   :  { %v367_v1 = vpop.eup %366 }
 0x45f   :  { %275 = vperm.xlu2 %358, %v367_v1  }
 0x4b9   :  { %v276_v3 = vpop.permute.xlu2 %275 }
 0x4ba   :  { %v278_v4 = vmul.f32 %v342_v2, %v276_v3 }
 0x4bc   :  { %v280_v5 = vsel %vm279_vm15, %v278_v4, 0.0 }
 0x4bd   :  { %v281_v6 = vrot.slane %v280_v5, 4 }
 0x4bf   :  { %v282_v8 = vadd.f32 %v281_v6, %v280_v5 }
 0x4c1   :  { %v283_v10 = vrot.slane %v282_v8, 2 }
 0x4c3   :  { %v284_v12 = vadd.f32 %v283_v10, %v282_v8 }
 0x4c5   :  { %v285_v13 = vrot.slane %v284_v12, 1 }
 0x4c7   :  { %v286_v7 = vadd.f32 %v285_v13, %v284_v12 }
 0x4c9   :  { %288 = vst.msk [vmem:[#allocation2] sm:$0x1] %vm287_vm0, %v286_v7 }
 0x4ca   :  { %299 = dma.vmem_to_hbm [thread:$0]  %s295_s3, 16, %s297_s17, [#allocation3]  }
 0x4cb   :  { %392 = dma.done.wait [#allocation3], 16  }
 0x4cc   :  { %393 = vsyncadd [#allocation3], 4294967280 }
 0x4cd   :  { %304 = vsyncpa [#allocation3], 1 }

</bundles_post_ra>
